<compile_context>
chip_gen: v7x
topology: tpu7x:2x2x1
jax: 0.10.0
libtpu: 0.0.40
codegen_flags: <defaults>
</compile_context>

<pallas_src>
import functools

import jax
import jax.numpy as jnp
from jax.experimental import pallas as pl
from jax.experimental.pallas import tpu as pltpu

BETA = 1.0 / 9.0
_LANES = 128


def _smooth_l1_kernel(pred_ref, target_ref, out_ref, *, beta):
    # Compute in f32 regardless of input dtype (cheap; v5e has no bf16 VPU).
    p = pred_ref[...].astype(jnp.float32)
    t = target_ref[...].astype(jnp.float32)
    x = jnp.abs(p - t)
    if beta <= 0.0:
        # PyTorch special-cases beta == 0 to pure L1 (avoid divide-by-zero).
        out_ref[...] = x.astype(out_ref.dtype)
        return
    half_beta = 0.5 * beta          # trace-time constant
    half_inv_beta = 0.5 / beta      # trace-time constant -> single vmul, no divide
    l1 = x - half_beta
    l2 = half_inv_beta * x * x
    out_ref[...] = jnp.where(x >= beta, l1, l2).astype(out_ref.dtype)


def _smooth_l1_ref(pred, target, beta):
    x = jnp.abs(pred - target)
    if beta <= 0.0:
        return x
    return jnp.where(x >= beta, x - 0.5 * beta, 0.5 * x * x / beta)


def smooth_l1_loss(pred, target, beta=BETA, block_rows=2048,
                   min_pallas_elems=1 << 16):
    assert pred.shape == target.shape
    assert pred.dtype == target.dtype
    orig_shape = pred.shape
    total = pred.size

    # Tiny inputs: launch + layout plumbing dwarfs the work; let XLA fuse it.
    if total < min_pallas_elems:
        return _smooth_l1_ref(pred, target, beta)

    rows = pl.cdiv(total, _LANES)
    pad = rows * _LANES - total  # < 128 elements; zero for lane-aligned sizes

    def to2d(a):
        flat = a.reshape(-1)
        if pad:
            flat = jnp.pad(flat, (0, pad))
        return flat.reshape(rows, _LANES)

    p2, t2 = to2d(pred), to2d(target)

    # Largest sublane-aligned tile that fits; ragged last grid step is fine
    # for elementwise (OOB writes are dropped).
    br = min(block_rows, rows)
    if br != rows:
        br = max(8, (br // 8) * 8)

    grid = (pl.cdiv(rows, br),)
    spec = pl.BlockSpec((br, _LANES), lambda i: (i, 0))

    itemsize = pred.dtype.itemsize
    cost = pl.CostEstimate(
        flops=7 * total,
        transcendentals=0,
        bytes_accessed=3 * total * itemsize,
    )

    out2 = pl.pallas_call(
        functools.partial(_smooth_l1_kernel, beta=beta),
        out_shape=jax.ShapeDtypeStruct((rows, _LANES), pred.dtype),
        grid_spec=pltpu.PrefetchScalarGridSpec(
            num_scalar_prefetch=0,
            grid=grid,
            in_specs=[spec, spec],
            out_specs=spec,
        ),
        compiler_params=pltpu.CompilerParams(
            dimension_semantics=("parallel",),
            vmem_limit_bytes=32 << 20,  # headroom; safe on v5e/v6e/v7x
        ),
        cost_estimate=cost,
    )(p2, t2)

    if pad:
        return out2.reshape(-1)[:total].reshape(orig_shape)
    return out2.reshape(orig_shape)


if __name__ == "__main__":
    key = jax.random.PRNGKey(0)
    k1, k2 = jax.random.split(key)
    # small shapes consistent with a detection-style loss input
    pred = jax.random.normal(k1, (2, 4, 16, 16), dtype=jnp.float32)
    target = jax.random.normal(k2, (2, 4, 16, 16), dtype=jnp.float32)

    # Force the Pallas path so the kernel itself is exercised at this size.
    out = smooth_l1_loss(pred, target, min_pallas_elems=0)
    jax.block_until_ready(out)

    ref = _smooth_l1_ref(pred, target, BETA)
    assert out.shape == pred.shape
    assert jnp.allclose(out, ref, atol=1e-6, rtol=1e-6)

    print("KERNEL_OK")
</pallas_src>

<mosaic_0001>
module attributes {stable_mosaic.version = 11 : i64} {
  func.func @_smooth_l1_kernel(%arg0: i32, %arg1: memref<16x128xf32, #tpu.memory_space<vmem>>, %arg2: memref<16x128xf32, #tpu.memory_space<vmem>>, %arg3: memref<16x128xf32, #tpu.memory_space<vmem>>) attributes {dimension_semantics = [#tpu.dimension_semantics<parallel>], iteration_bounds = array<i64: 1>, scalar_prefetch = 0 : i64, scratch_operands = 0 : i64, tpu.core_type = #tpu.core_type<tc>, window_params = [{transform_indices = @transform_0, window_bounds = array<i64: 16, 128>}, {transform_indices = @transform_1, window_bounds = array<i64: 16, 128>}, {transform_indices = @transform_2, window_bounds = array<i64: 16, 128>}]} {
    %c0 = arith.constant 0 : index
    %c0_0 = arith.constant 0 : index
    %0 = vector.load %arg1[%c0, %c0_0] : memref<16x128xf32, #tpu.memory_space<vmem>>, vector<16x128xf32>
    %c0_1 = arith.constant 0 : index
    %c0_2 = arith.constant 0 : index
    %1 = vector.load %arg2[%c0_1, %c0_2] : memref<16x128xf32, #tpu.memory_space<vmem>>, vector<16x128xf32>
    %2 = arith.subf %0, %1 : vector<16x128xf32>
    %3 = math.absf %2 : vector<16x128xf32>
    %cst = arith.constant 0.055555556 : f32
    %4 = vector.broadcast %cst : f32 to vector<16x128xf32>
    %5 = arith.subf %3, %4 : vector<16x128xf32>
    %cst_3 = arith.constant 4.500000e+00 : f32
    %6 = vector.broadcast %cst_3 : f32 to vector<16x128xf32>
    %7 = arith.mulf %6, %3 : vector<16x128xf32>
    %8 = arith.mulf %7, %3 : vector<16x128xf32>
    %cst_4 = arith.constant 0.111111112 : f32
    %9 = vector.broadcast %cst_4 : f32 to vector<16x128xf32>
    %10 = arith.cmpf oge, %3, %9 : vector<16x128xf32>
    %11 = arith.select %10, %5, %8 : vector<16x128xi1>, vector<16x128xf32>
    %c0_5 = arith.constant 0 : index
    %c0_6 = arith.constant 0 : index
    %12 = vector.load %arg3[%c0_5, %c0_6] : memref<16x128xf32, #tpu.memory_space<vmem>>, vector<16x128xf32>
    tpu.vector_store %arg3[%c0_5, %c0_6], %11 {strides = array<i32>} : memref<16x128xf32, #tpu.memory_space<vmem>>, vector<16x128xf32>,
    return
  }
  func.func @transform_0(%arg0: i32) -> (i32, i32) {
    %c0_i32 = arith.constant 0 : i32
    %c0_i32_0 = arith.constant 0 : i32
    return %arg0, %c0_i32 : i32, i32
  }
  func.func @transform_1(%arg0: i32) -> (i32, i32) {
    %c0_i32 = arith.constant 0 : i32
    %c0_i32_0 = arith.constant 0 : i32
    return %arg0, %c0_i32 : i32, i32
  }
  func.func @transform_2(%arg0: i32) -> (i32, i32) {
    %c0_i32 = arith.constant 0 : i32
    %c0_i32_0 = arith.constant 0 : i32
    return %arg0, %c0_i32 : i32, i32
  }
}

</mosaic_0001>

<bundles_post_ra>
// kernel: tpu_custom_call.1
= control target key start
LH: loop header
LB: loop body
LE: loop exit
PB: predicated region body
PF: predicated region fallthrough
CT: control target
= control target key end

     0   :  { %7 = vsyncpa [#allocation3], 0  ;;  %s222_s0 = inlined_call_operand.hbm [shape: f32[16,128], index: 0, kind: input, shape index: {}]   ;;  %s223_s1 = inlined_call_operand.hbm [shape: f32[16,128], index: 1, kind: input, shape index: {}]   ;;  %s224_s2 = inlined_call_operand.hbm [shape: f32[16,128], index: 2, kind: output, shape index: {}]  }
   0x1   :  { %8 = vsyncpa [#allocation6], 0 }
   0x2   :  { %9 = vsyncpa [#allocation4], 0  ;;  %s157_s9 = smov [#allocation2]   ;;  %s85_s13 = scalar_lea.hbm %s222_s0, 256 }
   0x3   :  { %s15_s10 = sshll.u32 %s157_s9, 4  ;;  %p86_p0 = scmp.ne.s32.totalorder %s222_s0, %s85_s13  ;;  %s16_s10 = int_to_ptr.vmem [resolvable:$true] %s15_s10 }
   0x4   :  { %p89_p1 = scmp.lt.u32.totalorder %s85_s13, %s222_s0 }
   0x6   :  { %p91_p2 = pnand %p89_p1, %p86_p0 }
   0x8   :  { %94 = shalt.err (!%p91_p2)
}
   0x9   :  { %s95_s18 = scalar_lea.vmem %s16_s10, 256  ;;  %p100_p4 = scmp.lt.s32.totalorder %s16_s10, %s16_s10 }
   0xa   :  { %p96_p3 = scmp.ne.s32.totalorder %s16_s10, %s95_s18  ;;  %p101_p5 = scmp.lt.s32.totalorder %s95_s18, %s95_s18 }
   0xc   :  { %p102_p6 = por %p101_p5, %p100_p4 }
   0xe   :  { %p103_p7 = pnand %p102_p6, %p96_p3 }
  0x10   :  { %106 = shalt.err (!%p103_p7)
}
  0x11   :  { %s158_s19 = smov 128   ;;  %s159_s20 = smov 8  }
  0x12   :  { %21 = dma.hbm_to_vmem [thread:$0]  %s222_s0, 256, %s16_s10, [#allocation3], %s158_s19, %s158_s19, %s159_s20  }
  0x13   :  { %s160_s23 = smov [#allocation5]   ;;  %s107_s27 = scalar_lea.hbm %s223_s1, 256 }
  0x14   :  { %s27_s24 = sshll.u32 %s160_s23, 4  ;;  %p108_p8 = scmp.ne.s32.totalorder %s223_s1, %s107_s27  ;;  %s28_s24 = int_to_ptr.vmem [resolvable:$true] %s27_s24 }
  0x15   :  { %p111_p9 = scmp.lt.u32.totalorder %s107_s27, %s223_s1 }
  0x17   :  { %p113_p10 = pnand %p111_p9, %p108_p8 }
  0x19   :  { %116 = shalt.err (!%p113_p10)
}
  0x1a   :  { %s117_s4 = scalar_lea.vmem %s28_s24, 256  ;;  %p122_p12 = scmp.lt.s32.totalorder %s28_s24, %s28_s24 }
  0x1b   :  { %p118_p11 = scmp.ne.s32.totalorder %s28_s24, %s117_s4  ;;  %p123_p13 = scmp.lt.s32.totalorder %s117_s4, %s117_s4 }
  0x1d   :  { %p124_p0 = por %p123_p13, %p122_p12 }
  0x1f   :  { %p125_p1 = pnand %p124_p0, %p118_p11 }
  0x21   :  { %128 = shalt.err (!%p125_p1)
}
  0x22   :  { %33 = dma.hbm_to_vmem [thread:$0]  %s223_s1, 256, %s28_s24, [#allocation6], %s158_s19, %s158_s19, %s159_s20  }
  0x23   :  { %151 = dma.done.wait [#allocation3], 256  }
  0x24   :  { %152 = vsyncadd [#allocation3], 4294967040 }
  0x25   :  { %153 = dma.done.wait [#allocation6], 256  }
  0x26   :  { %154 = vsyncadd [#allocation6], 4294967040  ;;  %v40_v0 = vld [vmem:[#allocation2] sm:$0xff]  ;;  %v42_v1 = vld [vmem:[#allocation5] sm:$0xff]  ;;  %s161_s6 = smov [#allocation7]  }
  0x27   :  { %v41_v2 = vld [vmem:[#allocation2 + $0x8] sm:$0xff]  ;;  %v44_v3 = vsub.f32 %v40_v0, %v42_v1  ;;  %v43_v4 = vld [vmem:[#allocation5 + $0x8] sm:$0xff]  ;;  %s65_s7 = sshll.u32 %s161_s6, 4  ;;  %s66_s7 = int_to_ptr.vmem [resolvable:$true] %s65_s7 }
  0x28   :  { %v45_v5 = vsub.f32 %v41_v2, %v43_v4  ;;  %s129_s1 = scalar_lea.vmem %s66_s7, 256  ;;  %p134_p3 = scmp.lt.s32.totalorder %s66_s7, %s66_s7 }
  0x29   :  { %v46_v6 = vand.u32 2147483647, %v44_v3  ;;  %p130_p2 = scmp.ne.s32.totalorder %s66_s7, %s129_s1  ;;  %p135_p4 = scmp.lt.s32.totalorder %s129_s1, %s129_s1 }
  0x2a   :  { %v47_v7 = vand.u32 2147483647, %v45_v5 }
  0x2b   :  { %v78_v8 = vadd.f32 -0.055555556, %v46_v6  ;;  %v50_v9 = vmul.f32 4.5, %v46_v6  ;;  %vm54_vm0 = vcmp.ge.f32.partialorder %v46_v6, 0.11111111  ;;  %p136_p5 = por %p135_p4, %p134_p3 }
  0x2c   :  { %v79_v10 = vadd.f32 -0.055555556, %v47_v7  ;;  %v51_v11 = vmul.f32 4.5, %v47_v7  ;;  %vm55_vm1 = vcmp.ge.f32.partialorder %v47_v7, 0.11111111 }
  0x2d   :  { %v52_v12 = vmul.f32 %v50_v9, %v46_v6  ;;  %p137_p6 = pnand %p136_p5, %p130_p2 }
  0x2e   :  { %v53_v13 = vmul.f32 %v51_v11, %v47_v7 }
  0x2f   :  { %v56_v14 = vsel %vm54_vm0, %v78_v8, %v52_v12 }
  0x30   :  { %58 = vst [vmem:[#allocation7] sm:$0xff] %v56_v14  ;;  %v57_v15 = vsel %vm55_vm1, %v79_v10, %v53_v13 }
  0x31   :  { %59 = vst [vmem:[#allocation7 + $0x8] sm:$0xff] %v57_v15 }
  0x32   :  { %140 = shalt.err (!%p137_p6)
}
  0x33   :  { %s141_s10 = scalar_lea.hbm %s224_s2, 256 }
  0x34   :  { %p142_p7 = scmp.ne.s32.totalorder %s224_s2, %s141_s10  ;;  %p145_p8 = scmp.lt.u32.totalorder %s141_s10, %s224_s2 }
  0x36   :  { %p147_p9 = pnand %p145_p8, %p142_p7 }
  0x38   :  { %150 = shalt.err (!%p147_p9)
}
  0x39   :  { %71 = dma.vmem_to_hbm [thread:$0]  %s66_s7, 256, %s224_s2, [#allocation4], %s158_s19, %s158_s19, %s159_s20  }
  0x3a   :  { %155 = dma.done.wait [#allocation4], 256  }
  0x3b   :  { %156 = vsyncadd [#allocation4], 4294967040 }
  0x3c   :  { %75 = vsyncpa [#allocation3], 1 }
  0x3d   :  { %76 = vsyncpa [#allocation6], 1 }
  0x3e   :  { %77 = vsyncpa [#allocation4], 1 }

</bundles_post_ra>
